<compile_context>
chip_gen: v7x
topology: tpu7x:2x2x1
jax: 0.10.0
libtpu: 0.0.40
codegen_flags: <defaults>
</compile_context>

<pallas_src>
import functools

import jax
import jax.numpy as jnp
from jax.experimental import pallas as pl
from jax.experimental.pallas import tpu as pltpu

_LANE = 128
_SUBLANE = 8


def _round_up(x, m):
    return ((x + m - 1) // m) * m


def _br_kernel(x_ref, w_ref, b_ref, o_ref, *, proba: bool):
    # x_ref: (tile_n, F), w_ref: (F, Lp), b_ref: (1, Lp), o_ref: (tile_n, Lp)
    logits = jnp.dot(x_ref[...], w_ref[...], preferred_element_type=jnp.float32)
    logits = logits + b_ref[...]            # (1, Lp) VPU broadcast over batch tile
    if proba:
        o_ref[...] = jax.nn.sigmoid(logits).astype(o_ref.dtype)
    else:
        # sigmoid(z) > 0.5  <=>  z > 0 : exact, skips EUP transcendentals entirely.
        o_ref[...] = (logits > 0.0).astype(o_ref.dtype)


def _vmem_budget_and_limit():
    """Per-generation VMEM budget: ~96 MiB on 128-MiB chips, ~48 MiB on v7x."""
    try:
        cap = int(pltpu.get_tpu_info().vmem_capacity_bytes)
    except Exception:
        cap = 64 << 20   # conservative fallback (v7x-sized)
    budget = min(96 << 20, (cap * 3) // 4)
    limit = min(cap - (8 << 20), budget + (16 << 20))
    return budget, int(limit)


def _pick_tile_n(n_rows, f, l_pad, x_itemsize, w_itemsize, vmem_budget_bytes):
    """Largest batch tile (multiple of 8, <=2048) fitting the VMEM budget."""
    # (8,128) layout padding of minor dims — VMEM footprint, not logical bytes.
    f_vmem = _round_up(f, _LANE)
    l_vmem = _round_up(l_pad, _LANE)
    # Grid-invariant W + bias: DMA'd once but allocated double-buffered (see TODO).
    fixed = 2 * _round_up(f, _SUBLANE) * l_vmem * w_itemsize + 2 * _SUBLANE * l_vmem * 4
    # Double-buffered x tile + f32 output tile, per batch row.
    per_row = 2 * f_vmem * x_itemsize + 2 * l_vmem * 4
    budget_rows = (vmem_budget_bytes - fixed) // max(per_row, 1)
    tile_n = int(min(2048, n_rows, max(budget_rows, _SUBLANE)))
    # Keep >= ~4 grid steps for large N so the "parallel" batch axis can shard
    # across both TensorCores on v7x (floor of 512 rows keeps v5e/v6e at roofline).
    multi_core_cap = max(512, (n_rows // 4 // _SUBLANE) * _SUBLANE)
    tile_n = min(tile_n, multi_core_cap)
    return max(_SUBLANE, (tile_n // _SUBLANE) * _SUBLANE)


def binary_relevance_forward(x, w, b, *, proba=True, tile_n=None):
    """Fused forward over all `output_size` binary classifiers.

    x: (N, F)  float32 or bfloat16 (pass bf16 to halve x/W HBM traffic)
    w: (L, F)  stacked per-label Linear weights (out_features=1 each)
    b: (L,)    stacked per-label biases
    returns (N, L) float32 (probabilities, or 0/1 indicators if proba=False)
    """
    n, f = x.shape
    l = w.shape[0]
    out_dtype = jnp.float32

    # Adaptive L padding: lane-dense (unmasked) stores only pay when the padding
    # overhead in HBM bytes is small; tiny L keeps the full-dim (masked) block.
    l_aligned = _round_up(l, _LANE)
    l_pad = l_aligned if (l_aligned - l) <= (l // 8) else l

    # Transpose W once in the wrapper -> (F, Lp); no per-step .T inside the kernel.
    if l_pad != l:
        wt = jnp.zeros((f, l_pad), dtype=w.dtype).at[:, :l].set(w.T)
        b2 = jnp.zeros((1, l_pad), dtype=jnp.float32).at[:, :l].set(
            b.astype(jnp.float32).reshape(1, l)
        )
    else:
        wt = w.T
        b2 = b.astype(jnp.float32).reshape(1, l)

    vmem_budget, vmem_limit = _vmem_budget_and_limit()
    if tile_n is None:
        tile_n = _pick_tile_n(
            n, f, l_pad,
            jnp.dtype(x.dtype).itemsize,
            jnp.dtype(wt.dtype).itemsize,
            vmem_budget,
        )

    kernel = functools.partial(_br_kernel, proba=proba)
    out = pl.pallas_call(
        kernel,
        out_shape=jax.ShapeDtypeStruct((n, l_pad), out_dtype),
        grid=(pl.cdiv(n, tile_n),),                     # ragged last block is clipped
        in_specs=[
            pl.BlockSpec((tile_n, f), lambda i: (i, 0)),    # x batch tile
            pl.BlockSpec((f, l_pad), lambda i: (0, 0)),     # full W (pre-transposed)
            pl.BlockSpec((1, l_pad), lambda i: (0, 0)),     # full bias row
        ],
        out_specs=pl.BlockSpec((tile_n, l_pad), lambda i: (i, 0)),
        compiler_params=pltpu.CompilerParams(
            dimension_semantics=("parallel",),   # megacore sharding on v7x
            vmem_limit_bytes=vmem_limit,
        ),
    )(x, wt, b2)

    if l_pad != l:
        out = out[:, :l]
    return out


if __name__ == "__main__":
    # Small, deterministic shapes consistent with the module:
    #   input_size (F) = 32, output_size (L) = 4 labels, batch N = 16
    N, F, L = 16, 32, 4
    key = jax.random.PRNGKey(0)
    kx, kw, kb = jax.random.split(key, 3)

    x = jax.random.normal(kx, (N, F), dtype=jnp.float32)
    # Deterministic per-label classifier params (one Linear(F, 1) per label, stacked).
    w = jax.random.normal(kw, (L, F), dtype=jnp.float32) * 0.1
    b = jax.random.normal(kb, (L,), dtype=jnp.float32) * 0.1

    out_proba = jax.block_until_ready(binary_relevance_forward(x, w, b, proba=True))
    out_hard = jax.block_until_ready(binary_relevance_forward(x, w, b, proba=False))

    # Pure-JAX reference check.
    ref_logits = x @ w.T + b[None, :]
    ref = jax.nn.sigmoid(ref_logits)
    assert out_proba.shape == (N, L)
    assert jnp.allclose(out_proba, ref, atol=1e-5)
    assert jnp.array_equal(out_hard, (ref_logits > 0).astype(jnp.float32))

    # bf16 inputs supplied by the caller (halves x/W HBM traffic); f32 accumulation.
    out_bf16 = jax.block_until_ready(
        binary_relevance_forward(
            x.astype(jnp.bfloat16), w.astype(jnp.bfloat16), b, proba=True
        )
    )
    assert jnp.allclose(out_bf16, ref, atol=2e-2)

    # Batch not a multiple of the tile size (exercises the ragged-grid path, no N-pad copy).
    out_odd = jax.block_until_ready(binary_relevance_forward(x[:13], w, b, proba=True))
    assert out_odd.shape == (13, L)
    assert jnp.allclose(out_odd, ref[:13], atol=1e-5)

    # Wide-L configuration (exercises the lane-padded branch: 250 -> 256 columns).
    L2 = 250
    kw2, kb2 = jax.random.split(kb, 2)
    w2 = jax.random.normal(kw2, (L2, F), dtype=jnp.float32) * 0.1
    b2v = jax.random.normal(kb2, (L2,), dtype=jnp.float32) * 0.1
    out_wide = jax.block_until_ready(binary_relevance_forward(x, w2, b2v, proba=True))
    ref_wide = jax.nn.sigmoid(x @ w2.T + b2v[None, :])
    assert out_wide.shape == (N, L2)
    assert jnp.allclose(out_wide, ref_wide, atol=1e-5)

    print("KERNEL_OK")
</pallas_src>

<mosaic_0001>
module attributes {stable_mosaic.version = 11 : i64} {
  func.func @_br_kernel(%arg0: i32, %arg1: memref<16x32xf32, #tpu.memory_space<vmem>>, %arg2: memref<32x4xf32, #tpu.memory_space<vmem>>, %arg3: memref<1x4xf32, #tpu.memory_space<vmem>>, %arg4: memref<16x4xf32, #tpu.memory_space<vmem>>) attributes {dimension_semantics = [#tpu.dimension_semantics<parallel>], iteration_bounds = array<i64: 1>, scalar_prefetch = 0 : i64, scratch_operands = 0 : i64, tpu.core_type = #tpu.core_type<tc>, window_params = [{transform_indices = @transform_0, window_bounds = array<i64: 16, 32>}, {pipeline_mode = #tpu.pipeline_mode<synchronous>, transform_indices = @transform_1, window_bounds = array<i64: 32, 4>}, {pipeline_mode = #tpu.pipeline_mode<synchronous>, transform_indices = @transform_2, window_bounds = array<i64: 1, 4>}, {transform_indices = @transform_3, window_bounds = array<i64: 16, 4>}]} {
    %c0 = arith.constant 0 : index
    %c0_0 = arith.constant 0 : index
    %0 = vector.load %arg1[%c0, %c0_0] : memref<16x32xf32, #tpu.memory_space<vmem>>, vector<16x32xf32>
    %c0_1 = arith.constant 0 : index
    %c0_2 = arith.constant 0 : index
    %1 = vector.load %arg2[%c0_1, %c0_2] : memref<32x4xf32, #tpu.memory_space<vmem>>, vector<32x4xf32>
    %cst = arith.constant dense<0.000000e+00> : vector<16x4xf32>
    %2 = tpu.matmul %0, %1, %cst {dimension_numbers = #tpu.dot_dimension_numbers<[1], [0], [0], [1], [0, 0, 1, 1], [], []>} : vector<16x32xf32>, vector<32x4xf32>, vector<16x4xf32> -> vector<16x4xf32>
    %c0_3 = arith.constant 0 : index
    %c0_4 = arith.constant 0 : index
    %3 = vector.load %arg3[%c0_3, %c0_4] : memref<1x4xf32, #tpu.memory_space<vmem>>, vector<1x4xf32>
    %4 = vector.broadcast %3 : vector<1x4xf32> to vector<16x4xf32>
    %5 = arith.addf %2, %4 : vector<16x4xf32>
    %6 = arith.negf %5 : vector<16x4xf32>
    %7 = math.exp %6 : vector<16x4xf32>
    %cst_5 = arith.constant 1.000000e+00 : f32
    %8 = vector.broadcast %cst_5 : f32 to vector<16x4xf32>
    %9 = arith.addf %8, %7 : vector<16x4xf32>
    %10 = arith.divf %8, %9 : vector<16x4xf32>
    %c0_6 = arith.constant 0 : index
    %c0_7 = arith.constant 0 : index
    %11 = vector.load %arg4[%c0_6, %c0_7] : memref<16x4xf32, #tpu.memory_space<vmem>>, vector<16x4xf32>
    tpu.vector_store %arg4[%c0_6, %c0_7], %10 {strides = array<i32>} : memref<16x4xf32, #tpu.memory_space<vmem>>, vector<16x4xf32>,
    return
  }
  func.func @transform_0(%arg0: i32) -> (i32, i32) {
    %c0_i32 = arith.constant 0 : i32
    %c0_i32_0 = arith.constant 0 : i32
    return %arg0, %c0_i32 : i32, i32
  }
  func.func @transform_1(%arg0: i32) -> (i32, i32) {
    %c0_i32 = arith.constant 0 : i32
    %c0_i32_0 = arith.constant 0 : i32
    %c0_i32_1 = arith.constant 0 : i32
    return %c0_i32, %c0_i32_0 : i32, i32
  }
  func.func @transform_2(%arg0: i32) -> (i32, i32) {
    %c0_i32 = arith.constant 0 : i32
    %c0_i32_0 = arith.constant 0 : i32
    %c0_i32_1 = arith.constant 0 : i32
    return %c0_i32, %c0_i32_0 : i32, i32
  }
  func.func @transform_3(%arg0: i32) -> (i32, i32) {
    %c0_i32 = arith.constant 0 : i32
    %c0_i32_0 = arith.constant 0 : i32
    return %arg0, %c0_i32 : i32, i32
  }
}

</mosaic_0001>

<bundles_post_ra>
// kernel: tpu_custom_call.1
= control target key start
LH: loop header
LB: loop body
LE: loop exit
PB: predicated region body
PF: predicated region fallthrough
CT: control target
= control target key end

     0   :  { %vm27_vm0 = vcmask 261120   ;;  %vm121_vm1 = vcmask 31744   ;;  %s213_s1 = inlined_call_operand.vmem [shape: f32[32,4], index: 1, kind: input, shape index: {}]   ;;  %s214_s0 = inlined_call_operand.vmem [shape: f32[16,32], index: 0, kind: input, shape index: {}]   ;;  %s215_s2 = inlined_call_operand.vmem [shape: f32[1,4], index: 2, kind: input, shape index: {}]   ;;  %s216_s3 = inlined_call_operand.vmem [shape: f32[16,4], index: 3, kind: output, shape index: {}]  }
   0x1   :  { %v16_v0 = vld [vmem:[%s213_s1] sm:$0xff]  ;;  %v17_v1 = vld [vmem:[%s213_s1 + $0x8] sm:$0xff]  ;;  %v18_v2 = vld [vmem:[%s213_s1 + $0x10] sm:$0xff] }
   0x2   :  { %v150_v3 = vpack.c.bf16 %v17_v1, %v16_v0  ;;  %v19_v4 = vld [vmem:[%s213_s1 + $0x18] sm:$0xff]  ;;  %v14_v5 = vld [vmem:[%s214_s0] sm:$0xff]  ;;  %v15_v7 = vld [vmem:[%s214_s0 + $0x8] sm:$0xff] }
   0x3   :  { %v154_v6 = vpack.c.bf16 %v19_v4, %v18_v2  ;;  %147 = vmatprep.mubr.msk.f32.mxu0 %vm27_vm0, %v14_v5  ;;  %v128_v8 = vld [vmem:[%s215_s2] ss:$0 sm:$0xff] }
   0x4   :  { %151 = vmatprep.subr.bf16.mxu0 %v150_v3 }
   0x5   :  { %153 = vmatpush3.bf16.msra.mxu0 %v150_v3 }
   0x6   :  { %155 = vmatprep.subr.bf16.mxu0 %v154_v6 }
   0x9   :  { %157 = vmatpush3.bf16.msra.mxu0 %v154_v6 }
   0xc   :  { %148 = vmatmul.mubr.msk.f32.vlgmr.msra.gmra.mrb[0].mxu0 %vm27_vm0, %v15_v7 }
  0xdf   :  { %v149_v9 = vpop.f32.mrb[0].mxu0 }
  0xe0   :  { %v106_v10 = vadd.f32 %v149_v9, %v128_v8  ;;  %v100_v11 = vpop.f32.mrb[1].mxu0 }
  0xe1   :  { %v101_v12 = vadd.f32 %v128_v8, %v100_v11 }
  0xe2   :  { %v132_v13 = vmul.f32 -1.442695, %v106_v10 }
  0xe3   :  { %v131_v14 = vmul.f32 -1.442695, %v101_v12 }
  0xe4   :  { %158 = vpow2.f32 %v132_v13 }
  0xe5   :  { %160 = vpow2.f32 %v131_v14 }
  0xee   :  { %v159_v15 = vpop.eup %158 }
  0xef   :  { %v161_v16 = vpop.eup %160  ;;  %v116_v17 = vadd.f32 1.0, %v159_v15 }
  0xf0   :  { %v115_v18 = vadd.f32 1.0, %v161_v16 }
  0xf1   :  { %162 = vrcp.f32 %v116_v17 }
  0xf2   :  { %164 = vrcp.f32 %v115_v18 }
  0xfb   :  { %v163_v19 = vpop.eup %162 }
  0xfc   :  { %v165_v20 = vpop.eup %164  ;;  %123 = vst.msk [vmem:[%s216_s3 + $0x8] sm:$0xff] %vm121_vm1, %v163_v19 }
  0xfd   :  { %122 = vst.msk [vmem:[%s216_s3] sm:$0xff] %vm121_vm1, %v165_v20 }

</bundles_post_ra>
